<compile_context>
chip_gen: v7x
topology: tpu7x:2x2x1
jax: 0.10.0
libtpu: 0.0.40
codegen_flags: <defaults>
</compile_context>

<pallas_src>
import functools

import jax
import jax.numpy as jnp
from jax.experimental import pallas as pl
from jax.experimental.pallas import tpu as pltpu

_TARGET_BLOCK_BYTES = 4 << 20   # ~4 MiB per block; in+out double-buffered = 16 MiB VMEM


# --------------------------------------------------------------------------- #
# Kernel
# --------------------------------------------------------------------------- #
def _fix_neuron_kernel(params_ref, x_ref, o_ref, *, method, static_zero_zp):
    # Packed scalars in SMEM: [scale_inv, zero_point, quant_max, scale=1/scale_inv]
    scale_inv = params_ref[0]
    zp = params_ref[1]
    qmax = params_ref[2]
    scale = params_ref[3]

    x = x_ref[...]
    if x.dtype != jnp.float32:
        x = x.astype(jnp.float32)
    scaled = x * scale_inv

    if method == -1:
        # torch.fake_quantize_per_tensor_affine: round half to even
        q = jnp.round(scaled)
    else:
        # method == 2 (DPU round): round half up == floor(x + 0.5)
        q = jnp.floor(scaled + 0.5)

    if static_zero_zp:
        q = jnp.clip(q, -qmax, qmax - 1.0)
        out = q * scale if method == -1 else q / scale_inv
    else:
        q = jnp.clip(q + zp, -qmax, qmax - 1.0) - zp
        out = q * scale if method == -1 else q / scale_inv

    if out.dtype != o_ref.dtype:
        out = out.astype(o_ref.dtype)
    o_ref[...] = out


# --------------------------------------------------------------------------- #
# Wrapper helpers
# --------------------------------------------------------------------------- #
def _pick_width(n):
    """Largest lane-dense slab width that divides n (multiple of 128)."""
    for w in (1024, 512, 256, 128):
        if n % w == 0:
            return w
    return None


def _choose_block_rows(rows, width, itemsize):
    """Byte-based block budget + enough grid steps for v7x's two TensorCores."""
    sub = 8 * max(1, 4 // itemsize)          # min sublane tile: 8 f32 / 16 bf16 / 32 i8
    if rows <= sub:
        return rows                           # whole array as one block (always legal)
    budget = max(sub, (_TARGET_BLOCK_BYTES // (width * itemsize)) // sub * sub)
    # aim for >= ~4 grid steps so v7x can shard the parallel grid across 2 TCs
    quarter = max(sub, (-(-rows // 4) + sub - 1) // sub * sub)
    blk = min(budget, quarter)
    return rows if blk >= rows else blk       # multiple of `sub`; last block masked


def _run_kernel_2d(x2d, params, method, static_zero_zp, out_dtype):
    rows, width = x2d.shape
    block_rows = _choose_block_rows(rows, width, x2d.dtype.itemsize)
    kernel = functools.partial(
        _fix_neuron_kernel, method=method, static_zero_zp=static_zero_zp)
    return pl.pallas_call(
        kernel,
        out_shape=jax.ShapeDtypeStruct((rows, width), out_dtype),
        grid=(pl.cdiv(rows, block_rows),),
        in_specs=[
            pl.BlockSpec(memory_space=pltpu.MemorySpace.SMEM),   # packed scalars
            pl.BlockSpec((block_rows, width), lambda i: (i, 0)),  # input slab
        ],
        out_specs=pl.BlockSpec((block_rows, width), lambda i: (i, 0)),
        compiler_params=pltpu.CompilerParams(
            dimension_semantics=("parallel",),
            # Explicit: 4 MiB blocks x 4 buffers = 16 MiB, which is exactly the
            # v5e scoped-VMEM default; raise to 32 MiB (also the v6e/v7x default).
            vmem_limit_bytes=32 * 1024 * 1024,
        ),
    )(params, x2d)


def _fix_neuron_jnp(x, scale_inv, zero_point, quant_max, method=2):
    """Pure-JAX reference / tiny-tail path mirroring the PyTorch op."""
    xf = x.astype(jnp.float32)
    s_inv = jnp.float32(scale_inv)
    zp = jnp.float32(zero_point)
    qmax = jnp.float32(quant_max)
    scaled = xf * s_inv
    q = jnp.round(scaled) if method == -1 else jnp.floor(scaled + 0.5)
    q = jnp.clip(q + zp, -qmax, qmax - 1.0) - zp
    out = q * (1.0 / s_inv) if method == -1 else q / s_inv
    return out.astype(x.dtype)


# --------------------------------------------------------------------------- #
# Public forward
# --------------------------------------------------------------------------- #
def fix_neuron_forward(x, scale_inv, zero_point, quant_max, method=2):
    """Pallas implementation of FixNeuronWithBackward.forward.

    x:          float array (any shape, e.g. NCHW)
    scale_inv:  python float / scalar  (1/scale)
    zero_point: python int / scalar
    quant_max:  python int / scalar (quant range is [-quant_max, quant_max-1])
    method:     2 (DPU round-half-up, default) or -1 (torch fake_quantize).
    """
    orig_shape = x.shape
    orig_dtype = x.dtype

    flat = x.reshape(-1)                     # contiguous reshape: no HBM copy
    n = flat.shape[0]
    if n == 0:
        return x

    static_zero_zp = isinstance(zero_point, (int, float)) and zero_point == 0

    scale_inv_f = jnp.asarray(scale_inv, jnp.float32)
    params = jnp.stack([
        scale_inv_f,
        jnp.asarray(zero_point, jnp.float32),
        jnp.asarray(quant_max, jnp.float32),
        1.0 / scale_inv_f,                   # host-side reciprocal for method == -1
    ])

    w = _pick_width(n)
    if w is not None:
        # Zero-copy path: slab width divides n exactly -> no pad, no slice.
        out_flat = _run_kernel_2d(
            flat.reshape(n // w, w), params, method, static_zero_zp, orig_dtype
        ).reshape(-1)
    else:
        # Ragged element count: 128-aligned bulk through the kernel, tiny tail
        # (< 128 elements) via a fused jnp expression.  This is ~2 extra HBM
        # passes (slice + concat) vs ~4 for the old pad + prefix-slice scheme.
        n_bulk = (n // 128) * 128
        if n_bulk:
            wb = _pick_width(n_bulk)
            bulk_out = _run_kernel_2d(
                flat[:n_bulk].reshape(n_bulk // wb, wb),
                params, method, static_zero_zp, orig_dtype,
            ).reshape(-1)
            tail_out = _fix_neuron_jnp(
                flat[n_bulk:], scale_inv, zero_point, quant_max, method)
            out_flat = jnp.concatenate([bulk_out, tail_out])
        else:
            # Fewer than 128 elements total: XLA's fused elementwise is optimal.
            out_flat = _fix_neuron_jnp(flat, scale_inv, zero_point, quant_max, method)

    return out_flat.reshape(orig_shape)


# TODO(synk): backward pass (straight-through estimator: grad_input = grad_output)
# is an identity and is not implemented as a Pallas kernel here.


if __name__ == "__main__":
    key = jax.random.PRNGKey(0)
    ka, kb, kc = jax.random.split(key, 3)

    # NCHW activation; 2*4*16*16 = 2048 elements -> zero-copy divisor-width path.
    x = jax.random.normal(ka, (2, 4, 16, 16), dtype=jnp.float32) * 3.0
    scale_inv, zero_point, quant_max, method = 32.0, 0, 128, 2
    out = jax.block_until_ready(
        fix_neuron_forward(x, scale_inv, zero_point, quant_max, method))
    ref = _fix_neuron_jnp(x, scale_inv, zero_point, quant_max, method)
    assert out.shape == x.shape and out.dtype == x.dtype
    assert float(jnp.max(jnp.abs(out - ref))) < 1e-5

    # Ragged element count (3*5*7*11 = 1155): aligned bulk via kernel + jnp tail,
    # non-zero zero_point exercises the dynamic-zp kernel path.
    x2 = jax.random.normal(kb, (3, 5, 7, 11), dtype=jnp.float32) * 2.0
    out2 = jax.block_until_ready(fix_neuron_forward(x2, 16.0, 1, 128, 2))
    ref2 = _fix_neuron_jnp(x2, 16.0, 1, 128, 2)
    assert out2.shape == x2.shape and out2.dtype == x2.dtype
    assert float(jnp.max(jnp.abs(out2 - ref2))) < 1e-5

    # method == -1 fallback (torch.fake_quantize_per_tensor_affine semantics).
    x3 = jax.random.normal(kc, (2, 4, 16, 16), dtype=jnp.float32)
    out3 = jax.block_until_ready(fix_neuron_forward(x3, 32.0, 0, 128, -1))
    ref3 = _fix_neuron_jnp(x3, 32.0, 0, 128, -1)
    assert float(jnp.max(jnp.abs(out3 - ref3))) < 1e-5

    print("KERNEL_OK")
</pallas_src>

<mosaic_0001>
module attributes {stable_mosaic.version = 11 : i64} {
  func.func @_fix_neuron_kernel(%arg0: i32, %arg1: memref<4xf32, #tpu.memory_space<smem>>, %arg2: memref<2x1024xf32, #tpu.memory_space<vmem>>, %arg3: memref<2x1024xf32, #tpu.memory_space<vmem>>) attributes {dimension_semantics = [#tpu.dimension_semantics<parallel>], iteration_bounds = array<i64: 1>, scalar_prefetch = 0 : i64, scratch_operands = 0 : i64, tpu.core_type = #tpu.core_type<tc>, window_params = [{transform_indices = @transform_0, window_bounds = array<i64: 4>}, {transform_indices = @transform_1, window_bounds = array<i64: 2, 1024>}, {transform_indices = @transform_2, window_bounds = array<i64: 2, 1024>}]} {
    %c0 = arith.constant 0 : index
    %0 = memref.load %arg1[%c0] : memref<4xf32, #tpu.memory_space<smem>>
    %c2 = arith.constant 2 : index
    %1 = memref.load %arg1[%c2] : memref<4xf32, #tpu.memory_space<smem>>
    %c0_0 = arith.constant 0 : index
    %c0_1 = arith.constant 0 : index
    %2 = vector.load %arg2[%c0_0, %c0_1] : memref<2x1024xf32, #tpu.memory_space<vmem>>, vector<2x1024xf32>
    %3 = vector.broadcast %0 : f32 to vector<2x1024xf32>
    %4 = arith.mulf %2, %3 : vector<2x1024xf32>
    %cst = arith.constant 5.000000e-01 : f32
    %5 = vector.broadcast %cst : f32 to vector<2x1024xf32>
    %6 = arith.addf %4, %5 : vector<2x1024xf32>
    %7 = math.floor %6 : vector<2x1024xf32>
    %cst_2 = arith.constant 0.000000e+00 : f32
    %8 = arith.subf %cst_2, %1 : f32
    %cst_3 = arith.constant 1.000000e+00 : f32
    %9 = arith.subf %1, %cst_3 : f32
    %10 = vector.broadcast %8 : f32 to vector<2x1024xf32>
    %11 = arith.maximumf %10, %7 : vector<2x1024xf32>
    %12 = vector.broadcast %9 : f32 to vector<2x1024xf32>
    %13 = arith.minimumf %12, %11 : vector<2x1024xf32>
    %14 = vector.broadcast %0 : f32 to vector<2x1024xf32>
    %15 = arith.divf %13, %14 : vector<2x1024xf32>
    %c0_4 = arith.constant 0 : index
    %c0_5 = arith.constant 0 : index
    %16 = vector.load %arg3[%c0_4, %c0_5] : memref<2x1024xf32, #tpu.memory_space<vmem>>, vector<2x1024xf32>
    tpu.vector_store %arg3[%c0_4, %c0_5], %15 {strides = array<i32>} : memref<2x1024xf32, #tpu.memory_space<vmem>>, vector<2x1024xf32>,
    return
  }
  func.func @transform_0(%arg0: i32) -> i32 {
    %c0_i32 = arith.constant 0 : i32
    %c0_i32_0 = arith.constant 0 : i32
    return %c0_i32 : i32
  }
  func.func @transform_1(%arg0: i32) -> (i32, i32) {
    %c0_i32 = arith.constant 0 : i32
    %c0_i32_0 = arith.constant 0 : i32
    return %arg0, %c0_i32 : i32, i32
  }
  func.func @transform_2(%arg0: i32) -> (i32, i32) {
    %c0_i32 = arith.constant 0 : i32
    %c0_i32_0 = arith.constant 0 : i32
    return %arg0, %c0_i32 : i32, i32
  }
}

</mosaic_0001>

<bundles_post_ra>
// kernel: tpu_custom_call.1
= control target key start
LH: loop header
LB: loop body
LE: loop exit
PB: predicated region body
PF: predicated region fallthrough
CT: control target
= control target key end

     0   :  { %7 = vsyncpa [#allocation5], 0  ;;  %s196_s0 = inlined_call_operand.hbm [shape: f32[4], index: 0, kind: input, shape index: {}]   ;;  %s197_s1 = inlined_call_operand.hbm [shape: f32[2,1024], index: 1, kind: input, shape index: {}]   ;;  %s198_s2 = inlined_call_operand.hbm [shape: f32[2,1024], index: 2, kind: output, shape index: {}]  }
   0x1   :  { %8 = vsyncpa [#allocation3], 0 }
   0x2   :  { %9 = vsyncpa [#allocation4], 0  ;;  %s82_s11 = scalar_lea.hbm %s196_s0, 16 }
   0x3   :  { %p83_p0 = scmp.ne.s32.totalorder %s196_s0, %s82_s11  ;;  %p86_p1 = scmp.lt.u32.totalorder %s82_s11, %s196_s0 }
   0x5   :  { %p88_p2 = pnand %p86_p1, %p83_p0 }
   0x7   :  { %91 = shalt.err (!%p88_p2)
}
   0x8   :  { %s142_s16 = smov [#allocation2]   ;;  %s143_s19 = smov [#allocation6]  }
   0x9   :  { %17 = dma.hbm_to_smem %s196_s0, 16, %s142_s16, [#allocation5]  }
   0xa   :  { %s24_s20 = sshll.u32 %s143_s19, 4  ;;  %s92_s23 = scalar_lea.hbm %s197_s1, 256  ;;  %s25_s20 = int_to_ptr.vmem [resolvable:$true] %s24_s20 }
   0xb   :  { %p93_p3 = scmp.ne.s32.totalorder %s197_s1, %s92_s23  ;;  %p96_p4 = scmp.lt.u32.totalorder %s92_s23, %s197_s1 }
   0xd   :  { %p98_p5 = pnand %p96_p4, %p93_p3 }
   0xf   :  { %101 = shalt.err (!%p98_p5)
}
  0x10   :  { %s102_s28 = scalar_lea.vmem %s25_s20, 256  ;;  %p107_p7 = scmp.lt.s32.totalorder %s25_s20, %s25_s20 }
  0x11   :  { %p103_p6 = scmp.ne.s32.totalorder %s25_s20, %s102_s28  ;;  %p108_p8 = scmp.lt.s32.totalorder %s102_s28, %s102_s28 }
  0x13   :  { %p109_p9 = por %p108_p8, %p107_p7 }
  0x15   :  { %p110_p10 = pnand %p109_p9, %p103_p6 }
  0x17   :  { %113 = shalt.err (!%p110_p10)
}
  0x18   :  { %27 = dma.hbm_to_vmem [thread:$0]  %s197_s1, 256, %s25_s20, [#allocation3]  }
  0x19   :  { %136 = dma.done.wait [#allocation5], 16  }
  0x1a   :  { %137 = vsyncadd [#allocation5], 4294967280 }
  0x1b   :  { %138 = dma.done.wait [#allocation3], 256  }
  0x1c   :  { %139 = vsyncadd [#allocation3], 4294967040 }
  0x1d   :  { %34 = sfence }
  0x1e   :  { %s35_s30 = sld [smem:[#allocation2]]  ;;  %s75_s3 = sld [smem:[#allocation2 + $0x2]]  ;;  %v37_v0 = vld [vmem:[#allocation6] sm:$0xff]  ;;  %v38_v1 = vld [vmem:[#allocation6 + $0x8] sm:$0xff] }
  0x1f   :  { %s144_s1 = smov [#allocation7]  }
  0x20   :  { %s65_s6 = sshll.u32 %s144_s1, 4  ;;  %s66_s6 = int_to_ptr.vmem [resolvable:$true] %s65_s6 }
  0x21   :  { %s114_s7 = scalar_lea.vmem %s66_s6, 256  ;;  %p119_p12 = scmp.lt.s32.totalorder %s66_s6, %s66_s6 }
  0x22   :  { %p115_p11 = scmp.ne.s32.totalorder %s66_s6, %s114_s7  ;;  %p120_p13 = scmp.lt.s32.totalorder %s114_s7, %s114_s7 }
  0x24   :  { %v39_v2 = vstv %s35_s30  ;;  %s46_s4 = ssub.f32 0.0, %s75_s3  ;;  %p121_p0 = por %p120_p13, %p119_p12 }
  0x25   :  { %v40_v3 = vmul.f32 %v39_v2, %v37_v0  ;;  %80 = vrcp.f32 %v39_v2  ;;  %v41_v4 = vmul.f32 %v39_v2, %v38_v1  ;;  %s76_s5 = sadd.f32 -1.0, %s75_s3 }
  0x26   :  { %v48_v7 = vstv %s46_s4  ;;  %p122_p1 = pnand %p121_p0, %p115_p11 }
  0x27   :  { %v42_v5 = vadd.f32 0.5, %v40_v3  ;;  %v43_v6 = vadd.f32 0.5, %v41_v4  ;;  %v51_v10 = vstv %s76_s5 }
  0x29   :  { %v44_v8 = vfloor.f32 %v42_v5  ;;  %v45_v9 = vfloor.f32 %v43_v6 }
  0x2b   :  { %v49_v11 = vmax.f32 %v48_v7, %v44_v8  ;;  %v50_v12 = vmax.f32 %v48_v7, %v45_v9 }
  0x2d   :  { %v52_v13 = vmin.f32 %v51_v10, %v49_v11  ;;  %v53_v14 = vmin.f32 %v51_v10, %v50_v12 }
  0x2f   :  { %v81_v15 = vpop.eup %80 }
  0x30   :  { %v55_v16 = vmul.f32 %v81_v15, %v52_v13  ;;  %v56_v17 = vmul.f32 %v81_v15, %v53_v14 }
  0x32   :  { %57 = vst [vmem:[#allocation7] sm:$0xff] %v55_v16  ;;  %58 = vst [vmem:[#allocation7 + $0x8] sm:$0xff] %v56_v17 }
  0x33   :  { %125 = shalt.err (!%p122_p1)
}
  0x34   :  { %s126_s10 = scalar_lea.hbm %s198_s2, 256 }
  0x35   :  { %p127_p2 = scmp.ne.s32.totalorder %s198_s2, %s126_s10  ;;  %p130_p3 = scmp.lt.u32.totalorder %s126_s10, %s198_s2 }
  0x37   :  { %p132_p4 = pnand %p130_p3, %p127_p2 }
  0x39   :  { %135 = shalt.err (!%p132_p4)
}
  0x3a   :  { %68 = dma.vmem_to_hbm [thread:$0]  %s66_s6, 256, %s198_s2, [#allocation4]  }
  0x3b   :  { %140 = dma.done.wait [#allocation4], 256  }
  0x3c   :  { %141 = vsyncadd [#allocation4], 4294967040 }
  0x3d   :  { %72 = vsyncpa [#allocation3], 1 }
  0x3e   :  { %73 = vsyncpa [#allocation4], 1 }
  0x3f   :  { %74 = vsyncpa [#allocation5], 1 }

</bundles_post_ra>
